<compile_context>
chip_gen: v5e
topology: v5e:2x2
jax: 0.10.0
libtpu: 0.0.40
codegen_flags: <defaults>
</compile_context>

<pallas_src>
import jax
import jax.numpy as jnp
from jax import lax
from jax.experimental import pallas as pl
from jax.experimental.pallas import tpu as pltpu

ALPHA = -0.5
BETA = -0.5
POLY_DEGREE = 2
BN_EPS = 1e-5
MXU_DTYPE = jnp.bfloat16        # matmul-operand dtype on every generation (incl. v5e)


# ----------------------------------------------------------------------------
# Per-generation configuration & tile planning.
# ----------------------------------------------------------------------------
def _kernel_config():
    kind = ""
    try:
        kind = jax.devices()[0].device_kind.lower()
    except Exception:
        pass
    newer = any(t in kind for t in ("v6", "v7", "7x"))        # bf16 VPU/EUP generations
    is_v7 = ("v7" in kind) or ("7x" in kind)                  # 64 MiB physical VMEM
    compute_dtype = jnp.bfloat16 if newer else jnp.float32    # v5e keeps fp32 VPU/EUP math
    vmem_limit = (48 if is_v7 else 64) * 1024 * 1024          # raise above scoped default
    tile_budget = (4 if is_v7 else 8) * 1024 * 1024           # per-tile byte budget
    return compute_dtype, vmem_limit, tile_budget


def _kan_lane_bytes(cin, cout, itemsize):
    # Double-buffered x & y blocks + fp32 accumulator + ~3 polynomial temps, per lane.
    return (2 * cin + 2 * cout + 3 * cin) * itemsize + 4 * cout


def _max_lane_bytes(cout, itemsize, kb):
    # Double-buffered y block covering kb groups + resident fp32 output, per lane.
    return 2 * kb * cout * itemsize + 4 * cout


def _plan_lane_tiling(P, worst_lane_bytes, budget):
    """Return (P_padded, lane_tile): either the full axis as one tile, or a
    multiple-of-128 divisor of the padded axis that fits the byte budget."""
    cap = max(128, budget // max(worst_lane_bytes, 1))
    if P <= cap:
        return P, P                      # single full tile: always a legal block shape
    cap = (cap // 128) * 128
    Pp = -(-P // 128) * 128
    for t in range(cap, 127, -128):
        if Pp % t == 0:
            return Pp, t
    return Pp, 128


# ----------------------------------------------------------------------------
# Jacobi recurrence (pure-JAX reference helper).
# ----------------------------------------------------------------------------
def _jacobi_polys(z, degree, a, b):
    polys = [jnp.ones_like(z)]
    if degree > 0:
        polys.append(((a - b) + (a + b + 2.0) * z) * 0.5)
    for i in range(2, degree + 1):
        ai = (2 * i + a + b - 1) * (2 * i + a + b) / (2 * i * (i + a + b))
        bi = (2 * i + a + b - 1) * (a * a - b * b) / (
            2 * i * (i + a + b) * (2 * i + a + b - 2))
        ci = -2 * (i + a - 1) * (i + b - 1) * (2 * i + a + b) / (
            2 * i * (i + a + b) * (2 * i + a + b - 2))
        polys.append((ai * z + bi) * polys[i - 1] + ci * polys[i - 2])
    return polys


# ----------------------------------------------------------------------------
# Kernel 1/2: one KAN layer (fused previous-BN affine) + BN partial statistics.
# ----------------------------------------------------------------------------
def _make_kan_kernel(apply_affine, degree):
    a, b = ALPHA, BETA

    def kernel(*refs):
        if apply_affine:
            scale_ref, bias_ref, x_ref, coef_ref, y_ref, stats_ref = refs
        else:
            x_ref, coef_ref, y_ref, stats_ref = refs

        x = x_ref[0]                                   # (cin, tp): channels on sublanes
        if apply_affine:                               # previous layer's folded BatchNorm
            x = x * scale_ref[...] + bias_ref[...]
        z = jnp.tanh(x)                                # EUP (bf16 on v6e/v7x)

        # Degree-0 term is a per-channel constant -> cancelled exactly by the following
        # BatchNorm (batch statistics); its matmul is skipped entirely.
        # Recurrence interleaved with its dot: live set {z, p_prev, p_cur, acc}.
        p_prev = jnp.ones_like(z)
        p_cur = 0.5 * ((a - b) + (a + b + 2.0) * z)    # P_1
        acc = jnp.dot(coef_ref[0], p_cur.astype(MXU_DTYPE),
                      preferred_element_type=jnp.float32)
        for i in range(2, degree + 1):
            ai = (2 * i + a + b - 1) * (2 * i + a + b) / (2 * i * (i + a + b))
            bi = (2 * i + a + b - 1) * (a * a - b * b) / (
                2 * i * (i + a + b) * (2 * i + a + b - 2))
            ci = -2 * (i + a - 1) * (i + b - 1) * (2 * i + a + b) / (
                2 * i * (i + a + b) * (2 * i + a + b - 2))
            p_prev, p_cur = p_cur, (ai * z + bi) * p_cur + ci * p_prev
            acc = acc + jnp.dot(coef_ref[i - 1], p_cur.astype(MXU_DTYPE),
                                preferred_element_type=jnp.float32)

        y_ref[0] = acc.astype(y_ref.dtype)

        # BatchNorm partial statistics via lane reductions (VPU/XLU), not the MXU.
        s = jnp.sum(acc, axis=1, keepdims=True)          # (cout, 1) column sums
        sq = jnp.sum(acc * acc, axis=1, keepdims=True)   # (cout, 1) sums of squares
        stats_ref[0, 0] = jnp.concatenate([s, sq], axis=-1)

    return kernel


def kan_layer(x, coef_k, scale, bias, *, tp, compute_dtype, vmem_limit):
    """x: (K, cin, Pp) -> y: (K, cout, Pp) plus per-channel (sum, sum_sq) partials."""
    K, cin, Pp = x.shape
    deg, cout, _ = coef_k.shape
    p_tiles = Pp // tp
    apply_affine = scale is not None

    args, in_specs = [], []
    if apply_affine:
        args += [scale.astype(compute_dtype), bias.astype(compute_dtype)]
        in_specs += [pl.BlockSpec((cin, 1), lambda k, p: (0, 0)),
                     pl.BlockSpec((cin, 1), lambda k, p: (0, 0))]
    args += [x.astype(compute_dtype), coef_k]
    in_specs += [pl.BlockSpec((1, cin, tp), lambda k, p: (k, 0, p)),
                 pl.BlockSpec((deg, cout, cin), lambda k, p: (0, 0, 0))]

    itemsize = jnp.dtype(compute_dtype).itemsize
    M = K * Pp
    cost = pl.CostEstimate(
        flops=2 * M * cin * cout * deg + 12 * M * cin + 6 * M * cout,
        transcendentals=M * cin,
        bytes_accessed=M * (cin + cout) * itemsize
        + deg * cin * cout * 2 + K * p_tiles * cout * 8)

    y, stats = pl.pallas_call(
        _make_kan_kernel(apply_affine, deg),
        grid=(K, p_tiles),
        in_specs=in_specs,
        out_specs=(pl.BlockSpec((1, cout, tp), lambda k, p: (k, 0, p)),
                   pl.BlockSpec((1, 1, cout, 2), lambda k, p: (k, p, 0, 0))),
        out_shape=(jax.ShapeDtypeStruct((K, cout, Pp), compute_dtype),
                   jax.ShapeDtypeStruct((K, p_tiles, cout, 2), jnp.float32)),
        compiler_params=pltpu.CompilerParams(
            dimension_semantics=("parallel", "parallel"),   # no cross-tile state
            vmem_limit_bytes=vmem_limit),
        cost_estimate=cost,
    )(*args)

    total = stats[..., 0].sum(axis=(0, 1))     # per-channel column sums
    total_sq = stats[..., 1].sum(axis=(0, 1))  # per-channel sums of squares
    return y, total, total_sq


# ----------------------------------------------------------------------------
# Kernel 3: last layer's BN affine + max over the group axis K.
# ----------------------------------------------------------------------------
def _bn_max_kernel(y_ref, scale_ref, bias_ref, o_ref):
    j = pl.program_id(1)
    v = y_ref[...].astype(jnp.float32) * scale_ref[...] + bias_ref[...]
    m = jnp.max(v, axis=0)                    # elementwise max across the kb groups

    @pl.when(j == 0)
    def _():
        o_ref[...] = m

    @pl.when(j > 0)
    def _():
        o_ref[...] = jnp.maximum(o_ref[...], m)


def bn_affine_max(y, scale, bias, *, tp, kb, vmem_limit):
    """y: (K, cout, Pp) -> (cout, Pp) = max_k(y * scale + bias)."""
    K, cout, Pp = y.shape
    p_tiles = Pp // tp
    k_blocks = K // kb
    cost = pl.CostEstimate(
        flops=3 * K * Pp * cout, transcendentals=0,
        bytes_accessed=K * Pp * cout * jnp.dtype(y.dtype).itemsize + Pp * cout * 4)
    return pl.pallas_call(
        _bn_max_kernel,
        grid=(p_tiles, k_blocks),                      # k_blocks last -> resident output
        in_specs=[pl.BlockSpec((kb, cout, tp), lambda i, j: (j, 0, i)),
                  pl.BlockSpec((cout, 1), lambda i, j: (0, 0)),
                  pl.BlockSpec((cout, 1), lambda i, j: (0, 0))],
        out_specs=pl.BlockSpec((cout, tp), lambda i, j: (0, i)),
        out_shape=jax.ShapeDtypeStruct((cout, Pp), jnp.float32),
        compiler_params=pltpu.CompilerParams(
            dimension_semantics=("parallel", "arbitrary"),
            vmem_limit_bytes=vmem_limit),
        cost_estimate=cost,
    )(y, scale, bias)


# ----------------------------------------------------------------------------
# Full KAN-MLP + BN + group-max on the (K, C, P) layout.
# ----------------------------------------------------------------------------
def _fold_bn(total, total_sq, n, gamma, beta):
    # TODO(synk): E[x^2]-E[x]^2 is cancellation-prone for very large n with |mean|>>std;
    # switch to a shifted / two-pass accumulation if BN scales look off at prod sizes.
    mean = total / n
    var = jnp.maximum(total_sq / n - mean * mean, 0.0)
    s = gamma * lax.rsqrt(var + BN_EPS)
    b = beta - mean * s
    return s.reshape(-1, 1), b.reshape(-1, 1)


def sa_kan_forward(x_kcp, layer_params, *, compute_dtype, vmem_limit, tile_budget):
    """x_kcp: (K, Cin, P) fp32 -> (mlp[-1], P) fp32 (after the final BN + max over K)."""
    assert POLY_DEGREE >= 1
    K, cin0, P = x_kcp.shape
    itemsize = jnp.dtype(compute_dtype).itemsize

    # Kernel-side coefficients: degrees 1..POLY_DEGREE only, layout (deg, cout, cin), bf16.
    coef_ks, cins, couts = [], [], []
    last = cin0
    for coef, _, _ in layer_params:
        cout = coef.shape[1]
        coef_ks.append(jnp.transpose(coef[:, :, 1:], (2, 1, 0)).astype(MXU_DTYPE))
        cins.append(last)
        couts.append(cout)
        last = cout

    # Lane-axis (P) tiling shared by all stages, sized from the VMEM byte budget.
    worst = max([_kan_lane_bytes(ci, co, itemsize) for ci, co in zip(cins, couts)]
                + [_max_lane_bytes(couts[-1], itemsize, 1)])
    Pp, tp = _plan_lane_tiling(P, worst, tile_budget)

    h = x_kcp.astype(compute_dtype)
    if Pp > P:
        h = jnp.pad(h, ((0, 0), (0, 0), (0, Pp - P)))   # zero columns; corrected below
    n_valid = K * P

    scale = bias = None
    for (coef, gamma, beta), coef_k in zip(layer_params, coef_ks):
        y, total, total_sq = kan_layer(h, coef_k, scale, bias, tp=tp,
                                       compute_dtype=compute_dtype,
                                       vmem_limit=vmem_limit)
        if Pp > P:
            # Padded columns are identical per channel (zero-padded input), so subtract
            # their stats contribution in the wrapper instead of masking in the kernel.
            pad_col = y[0, :, Pp - 1].astype(jnp.float32)
            n_pad = K * (Pp - P)
            total = total - n_pad * pad_col
            total_sq = total_sq - n_pad * pad_col * pad_col
        scale, bias = _fold_bn(total, total_sq, n_valid, gamma, beta)
        h = y

    # Final BN affine + max over K; fold as many groups per block as the budget allows.
    cout = couts[-1]
    kb = 1
    for d in range(K, 0, -1):
        if K % d == 0 and _max_lane_bytes(cout, itemsize, d) * tp <= tile_budget:
            kb = d
            break
    out = bn_affine_max(h, scale, bias, tp=tp, kb=kb, vmem_limit=vmem_limit)
    return out[:, :P] if Pp > P else out


# ----------------------------------------------------------------------------
# Plain-JAX glue: sampling / grouping (data-dependent gathers & sorts).
# ----------------------------------------------------------------------------
def farthest_point_sample(xyz, npoint):
    """xyz: (B, N, 3) -> (B, npoint) int32 indices."""
    # TODO(synk): PyTorch seeds FPS with torch.randint; here the start index is 0.
    B, N, _ = xyz.shape

    def body(i, state):
        centroids, distance, farthest = state
        centroids = centroids.at[:, i].set(farthest)
        centroid = jax.vmap(lambda p, f: p[f])(xyz, farthest)[:, None, :]
        dist = jnp.sum((xyz - centroid) ** 2, axis=-1)
        distance = jnp.minimum(distance, dist)
        farthest = jnp.argmax(distance, axis=-1).astype(jnp.int32)
        return centroids, distance, farthest

    centroids = jnp.zeros((B, npoint), dtype=jnp.int32)
    distance = jnp.full((B, N), 1e10, dtype=jnp.float32)
    farthest = jnp.zeros((B,), dtype=jnp.int32)
    centroids, _, _ = lax.fori_loop(0, npoint, body, (centroids, distance, farthest))
    return centroids


def index_points(points, idx):
    return jax.vmap(lambda p, i: p[i])(points, idx)


def square_distance(src, dst):
    dist = -2.0 * jnp.matmul(src, jnp.swapaxes(dst, 1, 2))
    dist += jnp.sum(src ** 2, axis=-1)[:, :, None]
    dist += jnp.sum(dst ** 2, axis=-1)[:, None, :]
    return dist


def query_ball_point(radius, nsample, xyz, new_xyz):
    sqrdists = square_distance(new_xyz, xyz)
    idx = jnp.argsort(sqrdists, axis=-1)[:, :, :nsample]
    group_first = jnp.repeat(idx[:, :, 0:1], nsample, axis=-1)
    mask = jnp.take_along_axis(sqrdists, idx, axis=-1) > radius ** 2
    return jnp.where(mask, group_first, idx)


def pointnet_sa_forward(xyz, points, params, npoint, radius, nsample):
    """xyz: (B, 3, N); points: (B, D, N) -> (new_xyz (B,3,S), new_points (B, mlp[-1], S))."""
    B, _, N = xyz.shape
    xyz_nc = jnp.transpose(xyz, (0, 2, 1))
    pts_nc = None if points is None else jnp.transpose(points, (0, 2, 1))

    fps_idx = farthest_point_sample(xyz_nc, npoint)
    new_xyz = index_points(xyz_nc, fps_idx)
    idx = query_ball_point(radius, nsample, xyz_nc, new_xyz)
    grouped_xyz = index_points(xyz_nc, idx) - new_xyz[:, :, None, :]
    if pts_nc is not None:
        grouped = jnp.concatenate([grouped_xyz, index_points(pts_nc, idx)], axis=-1)
    else:
        grouped = grouped_xyz

    S, K, Cin = npoint, nsample, grouped.shape[-1]
    # (B, S, K, C) -> (K, C, B*S): channels on sublanes, flattened points on lanes.
    x_kcp = jnp.transpose(grouped, (2, 3, 0, 1)).reshape(K, Cin, B * S)

    compute_dtype, vmem_limit, tile_budget = _kernel_config()
    feat = sa_kan_forward(x_kcp, params, compute_dtype=compute_dtype,
                          vmem_limit=vmem_limit, tile_budget=tile_budget)
    out_ch = feat.shape[0]
    new_points = jnp.transpose(feat.reshape(out_ch, B, S), (1, 0, 2))
    return jnp.transpose(new_xyz, (0, 2, 1)), new_points, x_kcp


# ----------------------------------------------------------------------------
# Parameter init (matches KANshared / BatchNorm1d default init shapes).
# ----------------------------------------------------------------------------
def init_params(key, in_channel, mlp, degree):
    params = []
    last = in_channel + 3
    for out_ch in mlp:
        key, k = jax.random.split(key)
        std = 1.0 / (last * (degree + 1))
        coef = std * jax.random.normal(k, (last, out_ch, degree + 1), dtype=jnp.float32)
        params.append((coef,                              # (in, out, degree+1)
                       jnp.ones((out_ch,), jnp.float32),   # BN gamma
                       jnp.zeros((out_ch,), jnp.float32))) # BN beta
        last = out_ch
    return params


# ----------------------------------------------------------------------------
# Pure-JAX reference: straightforward math (full Jacobi incl. degree 0, explicit
# training-mode BatchNorm), matmul operands in bf16 like the kernel.  Validates the
# degree-0 cancellation, the folded-affine fusion and the fused group-max.
# ----------------------------------------------------------------------------
def _reference(x_kcp, params, compute_dtype):
    K, cin, P = x_kcp.shape
    h = jnp.transpose(x_kcp, (0, 2, 1)).reshape(K * P, cin).astype(jnp.float32)
    for coef, gamma, beta in params:
        z = jnp.tanh(h.astype(compute_dtype))
        polys = _jacobi_polys(z, POLY_DEGREE, ALPHA, BETA)
        acc = None
        for d in range(POLY_DEGREE + 1):
            t = jnp.dot(polys[d].astype(jnp.bfloat16),
                        coef[:, :, d].astype(jnp.bfloat16),
                        preferred_element_type=jnp.float32)
            acc = t if acc is None else acc + t
        mean = jnp.mean(acc, axis=0)
        var = jnp.mean(jnp.square(acc - mean), axis=0)
        h = (acc - mean) * lax.rsqrt(var + BN_EPS) * gamma + beta   # fp32 normalized
    out_ch = h.shape[-1]
    return jnp.max(h.reshape(K, P, out_ch), axis=0)                  # (P, out_ch)


if __name__ == "__main__":
    B, N = 2, 64
    npoint, radius, nsample = 16, 0.4, 8
    in_channel = 3
    mlp = [16, 32]

    key = jax.random.PRNGKey(0)
    kx, kp, kw = jax.random.split(key, 3)
    xyz = jax.random.uniform(kx, (B, 3, N), dtype=jnp.float32)
    points = jax.random.normal(kp, (B, in_channel, N), dtype=jnp.float32)
    params = init_params(kw, in_channel, mlp, POLY_DEGREE)

    new_xyz, new_points, x_kcp = pointnet_sa_forward(
        xyz, points, params, npoint, radius, nsample)
    jax.block_until_ready((new_xyz, new_points))

    assert new_xyz.shape == (B, 3, npoint)
    assert new_points.shape == (B, mlp[-1], npoint)

    # Correctness of the Pallas hot path vs the straightforward (non-fused) reference.
    compute_dtype, _, _ = _kernel_config()
    ref_flat = _reference(x_kcp, params, compute_dtype)      # (B*npoint, mlp[-1])
    ref = jnp.transpose(ref_flat.reshape(B, npoint, mlp[-1]), (0, 2, 1))
    tol = 1e-1 if compute_dtype == jnp.bfloat16 else 2e-2
    max_err = float(jnp.max(jnp.abs(new_points - ref)))
    assert bool(jnp.allclose(new_points, ref, atol=tol, rtol=tol)), f"max_err={max_err}"

    print("KERNEL_OK")
</pallas_src>

<mosaic_0001>
module attributes {stable_mosaic.version = 11 : i64} {
  func.func @kernel(%arg0: i32, %arg1: i32, %arg2: memref<1x6x32xf32, #tpu.memory_space<vmem>>, %arg3: memref<2x16x6xbf16, #tpu.memory_space<vmem>>, %arg4: memref<1x16x32xf32, #tpu.memory_space<vmem>>, %arg5: memref<1x1x16x2xf32, #tpu.memory_space<vmem>>) attributes {dimension_semantics = [#tpu.dimension_semantics<parallel>, #tpu.dimension_semantics<parallel>], iteration_bounds = array<i64: 8, 1>, scalar_prefetch = 0 : i64, scratch_operands = 0 : i64, tpu.core_type = #tpu.core_type<tc>, window_params = [{transform_indices = @transform_0, window_bounds = array<i64: 1, 6, 32>}, {pipeline_mode = #tpu.pipeline_mode<synchronous>, transform_indices = @transform_1, window_bounds = array<i64: 2, 16, 6>}, {transform_indices = @transform_2, window_bounds = array<i64: 1, 16, 32>}, {transform_indices = @transform_3, window_bounds = array<i64: 1, 1, 16, 2>}]} {
    %c0 = arith.constant 0 : index
    %c0_0 = arith.constant 0 : index
    %c0_1 = arith.constant 0 : index
    %0 = vector.load %arg2[%c0, %c0_0, %c0_1] : memref<1x6x32xf32, #tpu.memory_space<vmem>>, vector<1x6x32xf32>
    %1 = vector.shape_cast %0 : vector<1x6x32xf32> to vector<6x32xf32>
    %2 = math.tanh %1 : vector<6x32xf32>
    %cst = arith.constant 1.000000e+00 : f32
    %3 = vector.broadcast %cst : f32 to vector<6x32xf32>
    %cst_2 = arith.constant 1.000000e+00 : f32
    %4 = vector.broadcast %cst_2 : f32 to vector<6x32xf32>
    %5 = arith.mulf %4, %2 : vector<6x32xf32>
    %cst_3 = arith.constant 0.000000e+00 : f32
    %6 = vector.broadcast %cst_3 : f32 to vector<6x32xf32>
    %7 = arith.addf %6, %5 : vector<6x32xf32>
    %cst_4 = arith.constant 5.000000e-01 : f32
    %8 = vector.broadcast %cst_4 : f32 to vector<6x32xf32>
    %9 = arith.mulf %8, %7 : vector<6x32xf32>
    %c0_5 = arith.constant 0 : index
    %c0_6 = arith.constant 0 : index
    %c0_7 = arith.constant 0 : index
    %10 = vector.load %arg3[%c0_5, %c0_6, %c0_7] : memref<2x16x6xbf16, #tpu.memory_space<vmem>>, vector<1x16x6xbf16>
    %11 = vector.shape_cast %10 : vector<1x16x6xbf16> to vector<16x6xbf16>
    %12 = arith.truncf %9 : vector<6x32xf32> to vector<6x32xbf16>
    %cst_8 = arith.constant dense<0.000000e+00> : vector<16x32xf32>
    %13 = tpu.matmul %11, %12, %cst_8 {dimension_numbers = #tpu.dot_dimension_numbers<[1], [0], [0], [1], [0, 0, 1, 1], [], []>} : vector<16x6xbf16>, vector<6x32xbf16>, vector<16x32xf32> -> vector<16x32xf32>
    %cst_9 = arith.constant 1.500000e+00 : f32
    %14 = vector.broadcast %cst_9 : f32 to vector<6x32xf32>
    %15 = arith.mulf %14, %2 : vector<6x32xf32>
    %cst_10 = arith.constant 0.000000e+00 : f32
    %16 = vector.broadcast %cst_10 : f32 to vector<6x32xf32>
    %17 = arith.addf %15, %16 : vector<6x32xf32>
    %18 = arith.mulf %17, %9 : vector<6x32xf32>
    %cst_11 = arith.constant -3.750000e-01 : f32
    %19 = vector.broadcast %cst_11 : f32 to vector<6x32xf32>
    %20 = arith.mulf %19, %3 : vector<6x32xf32>
    %21 = arith.addf %18, %20 : vector<6x32xf32>
    %c1 = arith.constant 1 : index
    %c0_12 = arith.constant 0 : index
    %c0_13 = arith.constant 0 : index
    %22 = vector.load %arg3[%c1, %c0_12, %c0_13] : memref<2x16x6xbf16, #tpu.memory_space<vmem>>, vector<1x16x6xbf16>
    %23 = vector.shape_cast %22 : vector<1x16x6xbf16> to vector<16x6xbf16>
    %24 = arith.truncf %21 : vector<6x32xf32> to vector<6x32xbf16>
    %cst_14 = arith.constant dense<0.000000e+00> : vector<16x32xf32>
    %25 = tpu.matmul %23, %24, %cst_14 {dimension_numbers = #tpu.dot_dimension_numbers<[1], [0], [0], [1], [0, 0, 1, 1], [], []>} : vector<16x6xbf16>, vector<6x32xbf16>, vector<16x32xf32> -> vector<16x32xf32>
    %26 = arith.addf %13, %25 : vector<16x32xf32>
    %c0_15 = arith.constant 0 : index
    %c0_16 = arith.constant 0 : index
    %c0_17 = arith.constant 0 : index
    %27 = vector.load %arg4[%c0_15, %c0_16, %c0_17] : memref<1x16x32xf32, #tpu.memory_space<vmem>>, vector<1x16x32xf32>
    %28 = vector.shape_cast %27 : vector<1x16x32xf32> to vector<16x32xf32>
    %29 = vector.shape_cast %26 : vector<16x32xf32> to vector<1x16x32xf32>
    tpu.vector_store %arg4[%c0_15, %c0_16, %c0_17], %29 {strides = array<i32>} : memref<1x16x32xf32, #tpu.memory_space<vmem>>, vector<1x16x32xf32>,
    %cst_18 = arith.constant dense<0.000000e+00> : vector<16xf32>
    %30 = vector.multi_reduction <add>, %26, %cst_18 [1] : vector<16x32xf32> to vector<16xf32>
    %31 = vector.shape_cast %30 : vector<16xf32> to vector<16x1xf32>
    %32 = arith.mulf %26, %26 : vector<16x32xf32>
    %cst_19 = arith.constant dense<0.000000e+00> : vector<16xf32>
    %33 = vector.multi_reduction <add>, %32, %cst_19 [1] : vector<16x32xf32> to vector<16xf32>
    %34 = vector.shape_cast %33 : vector<16xf32> to vector<16x1xf32>
    %35 = tpu.concatenate %31, %34 in 1 : vector<16x1xf32>, vector<16x1xf32> -> vector<16x2xf32>
    %c0_20 = arith.constant 0 : index
    %c0_21 = arith.constant 0 : index
    %c0_22 = arith.constant 0 : index
    %c0_23 = arith.constant 0 : index
    %36 = vector.load %arg5[%c0_20, %c0_21, %c0_22, %c0_23] : memref<1x1x16x2xf32, #tpu.memory_space<vmem>>, vector<1x1x16x2xf32>
    %37 = vector.shape_cast %36 : vector<1x1x16x2xf32> to vector<16x2xf32>
    %38 = vector.shape_cast %35 : vector<16x2xf32> to vector<1x1x16x2xf32>
    tpu.vector_store %arg5[%c0_20, %c0_21, %c0_22, %c0_23], %38 {strides = array<i32>} : memref<1x1x16x2xf32, #tpu.memory_space<vmem>>, vector<1x1x16x2xf32>,
    return
  }
  func.func @transform_0(%arg0: i32, %arg1: i32) -> (i32, i32, i32) {
    %c0_i32 = arith.constant 0 : i32
    %c0_i32_0 = arith.constant 0 : i32
    return %arg0, %c0_i32, %arg1 : i32, i32, i32
  }
  func.func @transform_1(%arg0: i32, %arg1: i32) -> (i32, i32, i32) {
    %c0_i32 = arith.constant 0 : i32
    %c0_i32_0 = arith.constant 0 : i32
    %c0_i32_1 = arith.constant 0 : i32
    %c0_i32_2 = arith.constant 0 : i32
    return %c0_i32, %c0_i32_0, %c0_i32_1 : i32, i32, i32
  }
  func.func @transform_2(%arg0: i32, %arg1: i32) -> (i32, i32, i32) {
    %c0_i32 = arith.constant 0 : i32
    %c0_i32_0 = arith.constant 0 : i32
    return %arg0, %c0_i32, %arg1 : i32, i32, i32
  }
  func.func @transform_3(%arg0: i32, %arg1: i32) -> (i32, i32, i32, i32) {
    %c0_i32 = arith.constant 0 : i32
    %c0_i32_0 = arith.constant 0 : i32
    %c0_i32_1 = arith.constant 0 : i32
    return %arg0, %arg1, %c0_i32, %c0_i32_0 : i32, i32, i32, i32
  }
}

</mosaic_0001>

<bundles_post_ra>
// kernel: tpu_custom_call.1
= control target key start
LH: loop header
LB: loop body
LE: loop exit
PB: predicated region body
PF: predicated region fallthrough
CT: control target
= control target key end

     0   :  { %9 = vsyncpa [#allocation3], 0  ;;  %s757_s0 = inlined_call_operand.vmem [shape: f32[8,6,32], index: 0, kind: input, shape index: {}]   ;;  %s758_s1 = inlined_call_operand.vmem [shape: bf16[2,16,6], index: 1, kind: input, shape index: {}]   ;;  %s759_s2 = inlined_call_operand.hbm [shape: f32[8,16,32], index: 2, kind: output, shape index: {0}]   ;;  %s760_s3 = inlined_call_operand.vmem [shape: f32[8,1,16,2], index: 3, kind: output, shape index: {1}]  }
   0x1   :  { %11 = vsyncpa [#allocation3 + $0x1], 0  ;;  %s641_s12 = smov 0   ;;  %s643_s13 = smov 0  }
   0x2   :  { %s645_s14 = smov 0   ;;  %s647_s15 = smov 0  }
   0x3   :  { %s649_s16 = smov 0   ;;  %s651_s17 = smov 0  }
   0x4 LB: > { %s450_s18 = sadd.s32 4294967295, %s617_s17   ;;  %s451_s19 = sadd.s32 4294967294, %s617_s17   ;;  %s617_s17 = sphi %s651_s17, %s17_s17   ;;  %s613_s16 = sphi %s649_s16, %s767_s16   ;;  %s609_s15 = sphi %s647_s15, %s766_s15   ;;  %s605_s14 = sphi %s645_s14, %s765_s14   ;;  %s601_s13 = sphi %s643_s13, %s764_s13   ;;  %s597_s12 = sphi %s641_s12, %s763_s12  }
   0x5   : > { %s29_s20 = sadd.s32 1, %s613_s16  ;;  %s87_s21 = sadd.s32 1, %s605_s14 }
   0x6   : > { %p31_p0 = scmp.ge.s32.totalorder %s29_s20, 8  ;;  %p97_p1 = scmp.ne.s32.totalorder %s605_s14, %s601_s13 }
   0x7   : > { %p98_p2 = scmp.eq.s32.totalorder %s450_s18, 7  ;;  %p103_p3 = scmp.ne.s32.totalorder %s601_s13, %s597_s12 }
   0x8   : > { %s769_s20 = smov (%p31_p0, %s29_s20), 0  ;;  %p104_p5 = scmp.eq.s32.totalorder %s451_s19, 7 }
   0x9   : > { %p681_p4 = por %p98_p2, %p97_p1  ;;  %s82_s23 = ssub.s32 %s613_s16, %s769_s20 }
   0xa   : > { %p454_p6 = scmp.ge.s32.totalorder %s617_s17, 1  ;;  %p85_p7 = scmp.eq.s32.totalorder %s82_s23, 0 }
   0xb   : > { %p688_p8 = por %p104_p5, %p103_p3  ;;  %p163_p9 = scmp.lt.s32.totalorder %s617_s17, 9 }
   0xc   : > { %s694_s25 = scalar_select %p85_p7, %s605_s14, %s87_s21  }
   0xd   : > { %p164_p10 = pnand %p454_p6, %p163_p9 }
   0xe   : > { %p198_p11 = scmp.lt.s32.totalorder (!%p164_p10), %s609_s15, 7  ;;  %s184_s8 = sand.u32 (!%p164_p10), 1, %s601_s13  }
   0xf   : > { %167 = sbr.rel (%p164_p10) target bundleno = 302 (0x12e), region = 28  ;;  %s455_s9 = sshll.u32 (!%p164_p10), %s184_s8, 4 }
  0x10   : > { %s479_s10 = sshll.u32 (!%p164_p10), %s609_s15, 4  ;;  %s186_s21 = scalar_lea.vmem (!%p164_p10), [#allocation2], %s455_s9 }
  0x11   : > { %s327_s19 = scalar_lea.hbm (!%p164_p10), %s759_s2, %s479_s10  ;;  %s328_s23 = sshll.u32 (!%p164_p10), %s186_s21, 4  ;;  %s329_s23 = int_to_ptr.vmem [resolvable:$true] %s328_s23 }
  0x12   : > { %s559_s5 = scalar_lea.hbm (!%p164_p10), %s759_s2, 128 }
  0x14   : > { %s698_s26 = scalar_select %p198_p11, %s609_s15, 7  ;;  %vm239_vm0 = vcmask 1042432   ;;  %v477_v7 = vld [vmem:[%s758_s1] sm:$0xff]  ;;  %vm235_vm1 = vcmask 48128   ;;  %v478_v11 = vld [vmem:[%s758_s1 + $0x8] sm:$0xff]  ;;  %vm282_vm2 = vcmask 261120  }
  0x15   : > { %s306_s15 = scalar_lea.sflag [#allocation3], %s184_s8 }
  0x16   : > { %s456_s27 = sshll.u32 %s698_s26, 3 }
  0x17   : > { %s204_s30 = scalar_lea.vmem %s757_s0, %s456_s27  ;;  %s330_s27 = sshll.u32 %s327_s19, 4  ;;  %s331_s27 = int_to_ptr.hbm [resolvable:$true] %s330_s27 }
  0x18   : > { %v215_v0 = vld [vmem:[%s204_s30] sm:$0x3f]  ;;  %s553_s28 = sshra.s32 %s331_s27, 4  ;;  %s554_s28 = int_to_ptr.hbm [resolvable:$true] %s553_s28 }
  0x19   : > { %537 = vtanh.f32 %v215_v0  ;;  %s555_s29 = scalar_lea.hbm %s554_s28, 16  ;;  %p560_p1 = scmp.lt.s32.totalorder %s554_s28, %s759_s2 }
  0x1a   : > { %p556_p12 = scmp.ne.s32.totalorder %s554_s28, %s555_s29  ;;  %p561_p2 = scmp.lt.s32.totalorder %s559_s5, %s555_s29 }
  0x1c   : > { %p557_p13 = pnand %p556_p12, %p681_p4  ;;  %p562_p3 = por %p561_p2, %p560_p1 }
  0x1e   : > { %p558_p0 = pneg %p557_p13 }
  0x1f   : > { %v538_v1 = vpop.eup %537 }
  0x20   : > { %v218_v2 = vmul.f32 0.5, %v538_v1  ;;  %v222_v3 = vmul.f32 1.5, %v538_v1  ;;  %p563_p5 = pnand %p562_p3, %p558_p0 }
  0x22   : > { %v221_v4 = vpack.c.bf16 %v218_v2, %v218_v2  ;;  %v224_v5 = vmul.f32 %v222_v3, %v218_v2 }
  0x24   : > { %v266_v6 = vsel %vm239_vm0, %v221_v4, 0  ;;  %v225_v8 = vadd.f32 -0.375, %v224_v5 }
  0x25   : > { %275 = vmatpush.bf16.msra.mxu1 %v266_v6 }
  0x26   : > { %v229_v9 = vpack.c.bf16 %v225_v8, %v225_v8 }
  0x28   : > { %470 = vmatmul.msk.bf16.vlgmr.msra.gmra.mxu1 %vm235_vm1, %v477_v7  ;;  %v241_v10 = vsel %vm239_vm0, %v229_v9, 0 }
  0x29   : > { %250 = vmatpush.bf16.msra.mxu0 %v241_v10 }
  0x2c   : > { %465 = vmatmul.msk.bf16.vlgmr.msra.gmra.mxu0 %vm235_vm1, %v478_v11 }
  0xa5   : > { %v277_v12 = vpop.f32.mrf.mxu1 }
  0xa9   : > { %v252_v13 = vpop.f32.mrf.mxu0 }
  0xaa   : > { %v278_v14 = vadd.f32 %v277_v12, %v252_v13 }
  0xac   : > { %283 = vst.msk [vmem:[%s186_s21] sm:$0xff] %vm282_vm2, %v278_v14  ;;  %v285_v15 = vsel %vm282_vm2, %v278_v14, 0.0  ;;  %v291_v16 = vmul.f32 %v278_v14, %v278_v14 }
  0xad   : > { %286 = vadd.xlane.f32.xlu0 %v285_v15  ;;  %v279_v18 = vpop.f32.mrf.mxu1 }
  0xae   : > { %v293_v17 = vsel %vm282_vm2, %v291_v16, 0.0 }
  0xaf   : > { %294 = vadd.xlane.f32.xlu1 %v293_v17 }
  0xb1   : > { %v254_v19 = vpop.f32.mrf.mxu0 }
  0xb2   : > { %v280_v20 = vadd.f32 %v279_v18, %v254_v19 }
  0xb4   : > { %284 = vst.msk [vmem:[%s186_s21 + $0x8] sm:$0xff] %vm282_vm2, %v280_v20  ;;  %v288_v21 = vsel %vm282_vm2, %v280_v20, 0.0  ;;  %v292_v22 = vmul.f32 %v280_v20, %v280_v20 }
  0xb5   : > { %289 = vadd.xlane.f32.xlu0 %v288_v21 }
  0xb6   : > { %566 = shalt.err (!%p563_p5)
}
  0xb7   : > { %s619_s8 = smov 128   ;;  %s620_s9 = smov 8   ;;  %v296_v23 = vsel %vm282_vm2, %v292_v22, 0.0  ;;  %vm299_vm3 = vcmask 7168   ;;  %vm302_vm4 = vcmask 15360  }
  0xb8   : > { %480 = dma.vmem_to_hbm [thread:$0]  (%p681_p4), %s329_s23, 256, %s331_s27, %s306_s15, %s619_s8, %s619_s8, %s620_s9   ;;  %297 = vadd.xlane.f32.xlu1 %v296_v23 }
  0xb9   : > { %s476_s10 = sshll.u32 %s698_s26, 4 }
  0xba   : > { %s213_s19 = scalar_lea.vmem %s760_s3, %s476_s10 }
 0x120   : > { %v287_v24 = vpop.xlane.xlu0 %286 }
 0x122   : > { %v295_v25 = vpop.xlane.xlu1 %294 }
 0x123   : > { %v300_v26 = vsel %vm299_vm3, %v287_v24, %v295_v25 }
 0x124   : > { %303 = vst.msk [vmem:[%s213_s19] sm:$0xff] %vm302_vm4, %v300_v26 }
 0x128   : > { %v290_v27 = vpop.xlane.xlu0 %289 }
 0x12b   : > { %v298_v28 = vpop.xlane.xlu1 %297 }
 0x12c   : > { %v301_v29 = vsel %vm299_vm3, %v290_v27, %v298_v28 }
 0x12d   : > { %304 = vst.msk [vmem:[%s213_s19 + $0x8] sm:$0xff] %vm302_vm4, %v301_v29 }
 0x12e PF: > { %p486_p4 = scmp.ge.s32.totalorder %s617_s17, 2  ;;  %s348_s22 = sand.u32 1, %s597_s12  }
 0x12f   : > { %s349_s26 = scalar_lea.sflag [#allocation3], %s348_s22 }
 0x130   : > { %p483_p6 = pnand %p486_p4, %p688_p8 }
 0x132   : > { %p484_p7 = pneg %p483_p6 }
 0x134   : > { %592 = dma.done.wait (%p484_p7), %s349_s26, 256  }
 0x135   : > { %594 = vsyncadd (%p484_p7), %s349_s26, 4294967040  ;;  %s17_s17 = sadd.s32 1, %s617_s17   ;;  %s763_s12 = smov %s601_s13 }
 0x136   : > { %p14_p9 = scmp.ge.s32.totalorder %s17_s17, 10   ;;  %s764_s13 = smov %s605_s14 }
 0x137   : > { %s765_s14 = smov %s694_s25  ;;  %s766_s15 = smov %s613_s16 }
 0x138   : > { %s767_s16 = smov %s769_s20  ;;  %16 = sbr.rel (!%p14_p9) target bundleno = 4 (0x4), region = 76 }
 0x13d   :  { %367 = vsyncpa [#allocation3], 1 }
 0x13e   :  { %369 = vsyncpa [#allocation3 + $0x1], 1 }

</bundles_post_ra>
